<compile_context>
chip_gen: v5e
topology: v5e:2x2
jax: 0.10.0
libtpu: 0.0.40
codegen_flags: <defaults>
</compile_context>

<pallas_src>
import numpy as np
import jax
import jax.numpy as jnp
from jax.experimental import pallas as pl
from jax.experimental.pallas import tpu as pltpu


# ---------------------------------------------------------------------------
# host-side (shape-only) constants: factored pool / bilinear-upsample maps
# ---------------------------------------------------------------------------
def _pool_matrix(in_size, out_size):
    """1-D AdaptiveAvgPool matrix (out_size, in_size), PyTorch window rule."""
    P = np.zeros((out_size, in_size), np.float64)
    for i in range(out_size):
        lo = (i * in_size) // out_size
        hi = ((i + 1) * in_size + out_size - 1) // out_size
        P[i, lo:hi] = 1.0 / (hi - lo)
    return P


def _upsample_matrix(out_size, in_size):
    """1-D bilinear interpolation matrix (out_size, in_size), align_corners=False."""
    U = np.zeros((out_size, in_size), np.float64)
    scale = in_size / out_size
    for o in range(out_size):
        src = max((o + 0.5) * scale - 0.5, 0.0)
        i0 = min(int(np.floor(src)), in_size - 1)
        i1 = min(i0 + 1, in_size - 1)
        l1 = src - i0
        U[o, i0] += 1.0 - l1
        U[o, i1] += l1
    return U


def _factored_spatial_maps(H, W, pool_sizes, smax):
    """Per level k (pool size s): K_k = Ubig_k @ Pbig_k with rank s*s.
       Returns
         PT (NP, HW, smax): pooled_row = x_row @ PT[k]    (cols >= s*s zero-padded)
         UT (NP, smax, HW): up_row     = pooled_row @ UT[k]
       so that up_row == x_row @ K_k^T exactly."""
    NP, HW = len(pool_sizes), H * W
    PT = np.zeros((NP, HW, smax), np.float32)
    UT = np.zeros((NP, smax, HW), np.float32)
    for k, s in enumerate(pool_sizes):
        Pbig = np.kron(_pool_matrix(H, s), _pool_matrix(W, s))            # (s*s, HW)
        Ubig = np.kron(_upsample_matrix(H, s), _upsample_matrix(W, s))    # (HW, s*s)
        PT[k, :, :s * s] = Pbig.T
        UT[k, :s * s, :] = Ubig.T
    return PT, UT


# ---------------------------------------------------------------------------
# kernel
# ---------------------------------------------------------------------------
def spp_kernel(x_ref, pt_ref, mix_ref, ut_ref, bias_ref, o_ref):
    # x_ref   : (R, HW)          R = bt*C rows = (batch-in-block, in-channel)
    # pt_ref  : (NP, HW, Smax)   transposed pooling factor per level (compute dtype)
    # mix_ref : (NP, R, R)       block-diag kron(I_bt, W_k) channel mix (compute dtype)
    # ut_ref  : (NP, Smax, HW)   transposed bilinear-upsample factor per level
    # bias_ref: (R, 1)  f32      conv bias per output row
    # o_ref   : (R, HW)
    num_levels = pt_ref.shape[0]
    cdt = pt_ref.dtype
    x = x_ref[...].astype(cdt)                                        # (R, HW)
    acc = jnp.zeros(o_ref.shape, jnp.float32)
    for k in range(num_levels):                                       # NP = 3, static unroll
        # pool (HW -> s*s), channel mix on the tiny pooled rep, upsample (s*s -> HW)
        pooled = jnp.dot(x, pt_ref[k], preferred_element_type=jnp.float32)
        mixed = jnp.dot(mix_ref[k], pooled.astype(cdt),
                        preferred_element_type=jnp.float32)
        acc = acc + jnp.dot(mixed.astype(cdt), ut_ref[k],
                            preferred_element_type=jnp.float32)
    o_ref[...] = (acc + bias_ref[...]).astype(o_ref.dtype)


# ---------------------------------------------------------------------------
# wrapper
# ---------------------------------------------------------------------------
def _pick_bt(B, C):
    """Batch elements per grid step (R = bt*C rows).
       - bt divides B (only full blocks: no padded reads/writes)
       - bt*C must be a multiple of 8 (sublane tile) unless bt == B (full block)
       - target R up to 256 (fill MXU M dim / amortize per-step overhead)
       - prefer >= 2 grid steps (v7x has 2 TensorCores; also enables the
         prefetch/writeback pipeline) whenever an aligned split exists."""
    ROW_CAP = 256
    divs = [d for d in range(1, B + 1) if B % d == 0]
    ok = [d for d in divs if (d * C) % 8 == 0 or d == B]
    capped = [d for d in ok if d * C <= ROW_CAP] or [min(ok)]
    multi = [d for d in capped if d < B]
    return max(multi) if multi else max(capped)


def _vmem_limit_bytes(resident_bytes):
    """Generation-aware scoped-VMEM request: grow with the working set but
       never past ~75% of the physical VMEM reported by the runtime."""
    phys = 128 * 1024 * 1024
    try:
        info = pltpu.get_tpu_info()
        phys = int(getattr(info, "vmem_capacity_bytes", phys) or phys)
    except Exception:
        pass
    want = max(32 * 1024 * 1024, 4 * int(resident_bytes))
    return int(min(want, (phys * 3) // 4))


def spp_block(x, conv_w, conv_b, pool_sizes=(1, 2, 4), compute_dtype=jnp.bfloat16):
    """x: (B, C, H, W); conv_w: (C, len(pool_sizes)*C) (1x1 conv weight, squeezed);
       conv_b: (C,).  Returns (B, C, H, W), matching SPPBlock.forward.
       compute_dtype: MXU input dtype (bf16 default); accumulation is always f32."""
    B, C, H, W = x.shape
    NP = len(pool_sizes)
    HW = H * W
    assert conv_w.shape == (C, NP * C)
    assert conv_b.shape == (C,)

    smax = max(s * s for s in pool_sizes)

    bt = _pick_bt(B, C)
    R = bt * C
    grid = ((B * C) // R,)

    # factored (rank <= smax) spatial maps: shape-only host constants, KB scale
    pt_np, ut_np = _factored_spatial_maps(H, W, pool_sizes, smax)
    pt = jnp.asarray(pt_np, dtype=compute_dtype)                      # (NP, HW, smax)
    ut = jnp.asarray(ut_np, dtype=compute_dtype)                      # (NP, smax, HW)

    # per-level channel-mix, block-diagonal over the bt batch elements in a block;
    # applied on the pooled (<= smax lanes) representation so the kron zero-padding
    # costs only R*R*smax MACs per level.
    eye = jnp.eye(bt, dtype=jnp.float32)
    mix = jnp.stack(
        [jnp.kron(eye, conv_w[:, k * C:(k + 1) * C].astype(jnp.float32))
         for k in range(NP)], axis=0).astype(compute_dtype)           # (NP, R, R)

    bias_rows = jnp.tile(conv_b.astype(jnp.float32), bt)[:, None]     # (R, 1)

    # lane-dense layout: spatial (H*W) on the 128-wide lane axis
    x2 = x.reshape(B * C, HW)

    x_item = jnp.dtype(x.dtype).itemsize
    c_item = jnp.dtype(compute_dtype).itemsize
    weight_bytes = (pt.size + ut.size + mix.size) * c_item + bias_rows.size * 4
    block_bytes = 2 * R * HW * x_item                 # one x block + one out block
    cost = pl.CostEstimate(
        # pool + upsample: 2*HW*smax MACs/row/level; mix: R*smax MACs/row/level
        flops=2 * (B * C) * NP * smax * (2 * HW + R),
        transcendentals=0,
        bytes_accessed=2 * B * C * HW * x_item + weight_bytes)

    out2 = pl.pallas_call(
        spp_kernel,
        out_shape=jax.ShapeDtypeStruct((B * C, HW), x.dtype),
        grid=grid,
        in_specs=[
            pl.BlockSpec((R, HW), lambda i: (i, 0)),
            # weights: constant index_map -> fetched once, VMEM-resident
            pl.BlockSpec((NP, HW, smax), lambda i: (0, 0, 0)),
            pl.BlockSpec((NP, R, R), lambda i: (0, 0, 0)),
            pl.BlockSpec((NP, smax, HW), lambda i: (0, 0, 0)),
            pl.BlockSpec((R, 1), lambda i: (0, 0)),
        ],
        out_specs=pl.BlockSpec((R, HW), lambda i: (i, 0)),
        compiler_params=pltpu.CompilerParams(
            dimension_semantics=("parallel",),
            vmem_limit_bytes=_vmem_limit_bytes(2 * block_bytes + 2 * weight_bytes)),
        cost_estimate=cost,
    )(x2, pt, mix, ut, bias_rows)

    return out2.reshape(B, C, H, W)


# ---------------------------------------------------------------------------
# pure-JAX reference (direct gather/pool implementation of the PyTorch forward)
# ---------------------------------------------------------------------------
def _adaptive_avg_pool2d_ref(x, s):
    B, C, H, W = x.shape
    def windows(n, m):
        return [((i * n) // m, ((i + 1) * n + m - 1) // m) for i in range(m)]
    rows = []
    for (h0, h1) in windows(H, s):
        cols = [jnp.mean(x[:, :, h0:h1, w0:w1], axis=(2, 3))
                for (w0, w1) in windows(W, s)]
        rows.append(jnp.stack(cols, axis=-1))
    return jnp.stack(rows, axis=-2)                                   # (B, C, s, s)


def _bilinear_upsample_ref(p, H, W):
    """F.interpolate(..., size=(H, W), mode='bilinear', align_corners=False)."""
    B, C, sH, sW = p.shape
    def idx(out_size, in_size):
        o = np.arange(out_size)
        src = np.maximum((o + 0.5) * in_size / out_size - 0.5, 0.0)
        i0 = np.minimum(np.floor(src).astype(np.int64), in_size - 1)
        i1 = np.minimum(i0 + 1, in_size - 1)
        l1 = src - i0
        return i0, i1, 1.0 - l1, l1
    y0, y1, wy0, wy1 = idx(H, sH)
    x0, x1, wx0, wx1 = idx(W, sW)
    g = lambda yi, xi: p[:, :, yi, :][:, :, :, xi]
    w = lambda a, b: jnp.asarray((a[:, None] * b[None, :]).astype(np.float32))
    return (g(y0, x0) * w(wy0, wx0) + g(y0, x1) * w(wy0, wx1)
            + g(y1, x0) * w(wy1, wx0) + g(y1, x1) * w(wy1, wx1))


def spp_block_ref(x, conv_w, conv_b, pool_sizes=(1, 2, 4)):
    B, C, H, W = x.shape
    feats = []
    for s in pool_sizes:
        pooled = _adaptive_avg_pool2d_ref(x.astype(jnp.float32), s)
        feats.append(_bilinear_upsample_ref(pooled, H, W))
    cat = jnp.concatenate(feats, axis=1)                              # (B, NP*C, H, W)
    out = jnp.einsum('om,bmhw->bohw', conv_w.astype(jnp.float32), cat)
    return (out + conv_b[None, :, None, None]).astype(x.dtype)


if __name__ == "__main__":
    B, C, H, W = 2, 4, 16, 16
    pool_sizes = (1, 2, 4)

    key = jax.random.PRNGKey(0)
    kx, kw, kb = jax.random.split(key, 3)
    x = jax.random.normal(kx, (B, C, H, W), dtype=jnp.float32)
    # PyTorch conv weight (C, 3C, 1, 1) squeezed to (C, 3C); bias (C,)
    conv_w = jax.random.normal(kw, (C, C * len(pool_sizes)), dtype=jnp.float32) * 0.1
    conv_b = jax.random.normal(kb, (C,), dtype=jnp.float32) * 0.1

    ref = spp_block_ref(x, conv_w, conv_b, pool_sizes)

    # f32 compute path: tight check against the PyTorch-semantics reference
    out_f32 = jax.block_until_ready(
        spp_block(x, conv_w, conv_b, pool_sizes, compute_dtype=jnp.float32))
    assert out_f32.shape == ref.shape == (B, C, H, W)
    assert jnp.allclose(out_f32, ref, atol=1e-3, rtol=1e-3), \
        float(jnp.max(jnp.abs(out_f32 - ref)))

    # bf16 compute path (default, per perf review): bf16 MXU inputs, f32 accumulation
    out_bf16 = jax.block_until_ready(spp_block(x, conv_w, conv_b, pool_sizes))
    assert out_bf16.shape == (B, C, H, W)
    assert jnp.allclose(out_bf16, ref, atol=2e-2, rtol=2e-2), \
        float(jnp.max(jnp.abs(out_bf16 - ref)))

    print("KERNEL_OK")
</pallas_src>

<mosaic_0001>
module attributes {stable_mosaic.version = 11 : i64} {
  func.func @spp_kernel(%arg0: i32, %arg1: memref<8x256xf32, #tpu.memory_space<vmem>>, %arg2: memref<3x256x16xf32, #tpu.memory_space<vmem>>, %arg3: memref<3x8x8xf32, #tpu.memory_space<vmem>>, %arg4: memref<3x16x256xf32, #tpu.memory_space<vmem>>, %arg5: memref<8x1xf32, #tpu.memory_space<vmem>>, %arg6: memref<8x256xf32, #tpu.memory_space<vmem>>) attributes {dimension_semantics = [#tpu.dimension_semantics<parallel>], iteration_bounds = array<i64: 1>, scalar_prefetch = 0 : i64, scratch_operands = 0 : i64, tpu.core_type = #tpu.core_type<tc>, window_params = [{transform_indices = @transform_0, window_bounds = array<i64: 8, 256>}, {pipeline_mode = #tpu.pipeline_mode<synchronous>, transform_indices = @transform_1, window_bounds = array<i64: 3, 256, 16>}, {pipeline_mode = #tpu.pipeline_mode<synchronous>, transform_indices = @transform_2, window_bounds = array<i64: 3, 8, 8>}, {pipeline_mode = #tpu.pipeline_mode<synchronous>, transform_indices = @transform_3, window_bounds = array<i64: 3, 16, 256>}, {pipeline_mode = #tpu.pipeline_mode<synchronous>, transform_indices = @transform_4, window_bounds = array<i64: 8, 1>}, {transform_indices = @transform_5, window_bounds = array<i64: 8, 256>}]} {
    %c0 = arith.constant 0 : index
    %c0_0 = arith.constant 0 : index
    %0 = vector.load %arg1[%c0, %c0_0] : memref<8x256xf32, #tpu.memory_space<vmem>>, vector<8x256xf32>
    %cst = arith.constant 0.000000e+00 : f32
    %1 = vector.broadcast %cst : f32 to vector<8x256xf32>
    %c0_1 = arith.constant 0 : index
    %c0_2 = arith.constant 0 : index
    %c0_3 = arith.constant 0 : index
    %2 = vector.load %arg2[%c0_1, %c0_2, %c0_3] : memref<3x256x16xf32, #tpu.memory_space<vmem>>, vector<1x256x16xf32>
    %3 = vector.shape_cast %2 : vector<1x256x16xf32> to vector<256x16xf32>
    %cst_4 = arith.constant dense<0.000000e+00> : vector<8x16xf32>
    %4 = tpu.matmul %0, %3, %cst_4 {dimension_numbers = #tpu.dot_dimension_numbers<[1], [0], [0], [1], [0, 0, 1, 1], [], []>} : vector<8x256xf32>, vector<256x16xf32>, vector<8x16xf32> -> vector<8x16xf32>
    %c0_5 = arith.constant 0 : index
    %c0_6 = arith.constant 0 : index
    %c0_7 = arith.constant 0 : index
    %5 = vector.load %arg3[%c0_5, %c0_6, %c0_7] : memref<3x8x8xf32, #tpu.memory_space<vmem>>, vector<1x8x8xf32>
    %6 = vector.shape_cast %5 : vector<1x8x8xf32> to vector<8x8xf32>
    %cst_8 = arith.constant dense<0.000000e+00> : vector<8x16xf32>
    %7 = tpu.matmul %6, %4, %cst_8 {dimension_numbers = #tpu.dot_dimension_numbers<[1], [0], [0], [1], [0, 0, 1, 1], [], []>} : vector<8x8xf32>, vector<8x16xf32>, vector<8x16xf32> -> vector<8x16xf32>
    %c0_9 = arith.constant 0 : index
    %c0_10 = arith.constant 0 : index
    %c0_11 = arith.constant 0 : index
    %8 = vector.load %arg4[%c0_9, %c0_10, %c0_11] : memref<3x16x256xf32, #tpu.memory_space<vmem>>, vector<1x16x256xf32>
    %9 = vector.shape_cast %8 : vector<1x16x256xf32> to vector<16x256xf32>
    %cst_12 = arith.constant dense<0.000000e+00> : vector<8x256xf32>
    %10 = tpu.matmul %7, %9, %cst_12 {dimension_numbers = #tpu.dot_dimension_numbers<[1], [0], [0], [1], [0, 0, 1, 1], [], []>} : vector<8x16xf32>, vector<16x256xf32>, vector<8x256xf32> -> vector<8x256xf32>
    %11 = arith.addf %1, %10 : vector<8x256xf32>
    %c1 = arith.constant 1 : index
    %c0_13 = arith.constant 0 : index
    %c0_14 = arith.constant 0 : index
    %12 = vector.load %arg2[%c1, %c0_13, %c0_14] : memref<3x256x16xf32, #tpu.memory_space<vmem>>, vector<1x256x16xf32>
    %13 = vector.shape_cast %12 : vector<1x256x16xf32> to vector<256x16xf32>
    %cst_15 = arith.constant dense<0.000000e+00> : vector<8x16xf32>
    %14 = tpu.matmul %0, %13, %cst_15 {dimension_numbers = #tpu.dot_dimension_numbers<[1], [0], [0], [1], [0, 0, 1, 1], [], []>} : vector<8x256xf32>, vector<256x16xf32>, vector<8x16xf32> -> vector<8x16xf32>
    %c1_16 = arith.constant 1 : index
    %c0_17 = arith.constant 0 : index
    %c0_18 = arith.constant 0 : index
    %15 = vector.load %arg3[%c1_16, %c0_17, %c0_18] : memref<3x8x8xf32, #tpu.memory_space<vmem>>, vector<1x8x8xf32>
    %16 = vector.shape_cast %15 : vector<1x8x8xf32> to vector<8x8xf32>
    %cst_19 = arith.constant dense<0.000000e+00> : vector<8x16xf32>
    %17 = tpu.matmul %16, %14, %cst_19 {dimension_numbers = #tpu.dot_dimension_numbers<[1], [0], [0], [1], [0, 0, 1, 1], [], []>} : vector<8x8xf32>, vector<8x16xf32>, vector<8x16xf32> -> vector<8x16xf32>
    %c1_20 = arith.constant 1 : index
    %c0_21 = arith.constant 0 : index
    %c0_22 = arith.constant 0 : index
    %18 = vector.load %arg4[%c1_20, %c0_21, %c0_22] : memref<3x16x256xf32, #tpu.memory_space<vmem>>, vector<1x16x256xf32>
    %19 = vector.shape_cast %18 : vector<1x16x256xf32> to vector<16x256xf32>
    %cst_23 = arith.constant dense<0.000000e+00> : vector<8x256xf32>
    %20 = tpu.matmul %17, %19, %cst_23 {dimension_numbers = #tpu.dot_dimension_numbers<[1], [0], [0], [1], [0, 0, 1, 1], [], []>} : vector<8x16xf32>, vector<16x256xf32>, vector<8x256xf32> -> vector<8x256xf32>
    %21 = arith.addf %11, %20 : vector<8x256xf32>
    %c2 = arith.constant 2 : index
    %c0_24 = arith.constant 0 : index
    %c0_25 = arith.constant 0 : index
    %22 = vector.load %arg2[%c2, %c0_24, %c0_25] : memref<3x256x16xf32, #tpu.memory_space<vmem>>, vector<1x256x16xf32>
    %23 = vector.shape_cast %22 : vector<1x256x16xf32> to vector<256x16xf32>
    %cst_26 = arith.constant dense<0.000000e+00> : vector<8x16xf32>
    %24 = tpu.matmul %0, %23, %cst_26 {dimension_numbers = #tpu.dot_dimension_numbers<[1], [0], [0], [1], [0, 0, 1, 1], [], []>} : vector<8x256xf32>, vector<256x16xf32>, vector<8x16xf32> -> vector<8x16xf32>
    %c2_27 = arith.constant 2 : index
    %c0_28 = arith.constant 0 : index
    %c0_29 = arith.constant 0 : index
    %25 = vector.load %arg3[%c2_27, %c0_28, %c0_29] : memref<3x8x8xf32, #tpu.memory_space<vmem>>, vector<1x8x8xf32>
    %26 = vector.shape_cast %25 : vector<1x8x8xf32> to vector<8x8xf32>
    %cst_30 = arith.constant dense<0.000000e+00> : vector<8x16xf32>
    %27 = tpu.matmul %26, %24, %cst_30 {dimension_numbers = #tpu.dot_dimension_numbers<[1], [0], [0], [1], [0, 0, 1, 1], [], []>} : vector<8x8xf32>, vector<8x16xf32>, vector<8x16xf32> -> vector<8x16xf32>
    %c2_31 = arith.constant 2 : index
    %c0_32 = arith.constant 0 : index
    %c0_33 = arith.constant 0 : index
    %28 = vector.load %arg4[%c2_31, %c0_32, %c0_33] : memref<3x16x256xf32, #tpu.memory_space<vmem>>, vector<1x16x256xf32>
    %29 = vector.shape_cast %28 : vector<1x16x256xf32> to vector<16x256xf32>
    %cst_34 = arith.constant dense<0.000000e+00> : vector<8x256xf32>
    %30 = tpu.matmul %27, %29, %cst_34 {dimension_numbers = #tpu.dot_dimension_numbers<[1], [0], [0], [1], [0, 0, 1, 1], [], []>} : vector<8x16xf32>, vector<16x256xf32>, vector<8x256xf32> -> vector<8x256xf32>
    %31 = arith.addf %21, %30 : vector<8x256xf32>
    %c0_35 = arith.constant 0 : index
    %c0_36 = arith.constant 0 : index
    %32 = vector.load %arg5[%c0_35, %c0_36] : memref<8x1xf32, #tpu.memory_space<vmem>>, vector<8x1xf32>
    %33 = vector.broadcast %32 : vector<8x1xf32> to vector<8x256xf32>
    %34 = arith.addf %31, %33 : vector<8x256xf32>
    %c0_37 = arith.constant 0 : index
    %c0_38 = arith.constant 0 : index
    %35 = vector.load %arg6[%c0_37, %c0_38] : memref<8x256xf32, #tpu.memory_space<vmem>>, vector<8x256xf32>
    tpu.vector_store %arg6[%c0_37, %c0_38], %34 {strides = array<i32>} : memref<8x256xf32, #tpu.memory_space<vmem>>, vector<8x256xf32>,
    return
  }
  func.func @transform_0(%arg0: i32) -> (i32, i32) {
    %c0_i32 = arith.constant 0 : i32
    %c0_i32_0 = arith.constant 0 : i32
    return %arg0, %c0_i32 : i32, i32
  }
  func.func @transform_1(%arg0: i32) -> (i32, i32, i32) {
    %c0_i32 = arith.constant 0 : i32
    %c0_i32_0 = arith.constant 0 : i32
    %c0_i32_1 = arith.constant 0 : i32
    %c0_i32_2 = arith.constant 0 : i32
    return %c0_i32, %c0_i32_0, %c0_i32_1 : i32, i32, i32
  }
  func.func @transform_2(%arg0: i32) -> (i32, i32, i32) {
    %c0_i32 = arith.constant 0 : i32
    %c0_i32_0 = arith.constant 0 : i32
    %c0_i32_1 = arith.constant 0 : i32
    %c0_i32_2 = arith.constant 0 : i32
    return %c0_i32, %c0_i32_0, %c0_i32_1 : i32, i32, i32
  }
  func.func @transform_3(%arg0: i32) -> (i32, i32, i32) {
    %c0_i32 = arith.constant 0 : i32
    %c0_i32_0 = arith.constant 0 : i32
    %c0_i32_1 = arith.constant 0 : i32
    %c0_i32_2 = arith.constant 0 : i32
    return %c0_i32, %c0_i32_0, %c0_i32_1 : i32, i32, i32
  }
  func.func @transform_4(%arg0: i32) -> (i32, i32) {
    %c0_i32 = arith.constant 0 : i32
    %c0_i32_0 = arith.constant 0 : i32
    %c0_i32_1 = arith.constant 0 : i32
    return %c0_i32, %c0_i32_0 : i32, i32
  }
  func.func @transform_5(%arg0: i32) -> (i32, i32) {
    %c0_i32 = arith.constant 0 : i32
    %c0_i32_0 = arith.constant 0 : i32
    return %arg0, %c0_i32 : i32, i32
  }
}

</mosaic_0001>

<bundles_post_ra>
// kernel: tpu_custom_call.1
= control target key start
LH: loop header
LB: loop body
LE: loop exit
PB: predicated region body
PF: predicated region fallthrough
CT: control target
= control target key end

     0   :  { %s996_s0 = inlined_call_operand.vmem [shape: f32[8,256], index: 0, kind: input, shape index: {}]   ;;  %s997_s1 = inlined_call_operand.vmem [shape: f32[3,256,16], index: 1, kind: input, shape index: {}]   ;;  %s998_s2 = inlined_call_operand.vmem [shape: f32[3,8,8], index: 2, kind: input, shape index: {}]   ;;  %s999_s3 = inlined_call_operand.vmem [shape: f32[3,16,256], index: 3, kind: input, shape index: {}]   ;;  %s1000_s4 = inlined_call_operand.vmem [shape: f32[8,1], index: 4, kind: input, shape index: {}]   ;;  %s1001_s5 = inlined_call_operand.hbm [shape: f32[8,256], index: 5, kind: output, shape index: {}]  }
   0x1   :  { %v38_v0 = vld [vmem:[%s997_s1 + $0x78] sm:$0xff]  ;;  %v37_v2 = vld [vmem:[%s997_s1 + $0x70] sm:$0xff]  ;;  %v36_v4 = vld [vmem:[%s997_s1 + $0x68] sm:$0xff] }
   0x2   :  { %v54_v1 = vld [vmem:[%s997_s1 + $0xf8] sm:$0xff]  ;;  %55 = vmatpush.msra.mxu0 %v38_v0  ;;  %v53_v3 = vld [vmem:[%s997_s1 + $0xf0] sm:$0xff]  ;;  %v52_v5 = vld [vmem:[%s997_s1 + $0xe8] sm:$0xff] }
   0x3   :  { %75 = vmatpush.msra.mxu1 %v54_v1  ;;  %v35_v6 = vld [vmem:[%s997_s1 + $0x60] sm:$0xff]  ;;  %v34_v8 = vld [vmem:[%s997_s1 + $0x58] sm:$0xff]  ;;  %v33_v10 = vld [vmem:[%s997_s1 + $0x50] sm:$0xff] }
   0x4   :  { %56 = vmatpush.msra.mxu0 %v37_v2  ;;  %v51_v7 = vld [vmem:[%s997_s1 + $0xe0] sm:$0xff]  ;;  %v50_v9 = vld [vmem:[%s997_s1 + $0xd8] sm:$0xff]  ;;  %v49_v11 = vld [vmem:[%s997_s1 + $0xd0] sm:$0xff] }
   0x5   :  { %76 = vmatpush.msra.mxu1 %v53_v3  ;;  %v32_v12 = vld [vmem:[%s997_s1 + $0x48] sm:$0xff] }
   0x6   :  { %57 = vmatpush.msra.mxu0 %v36_v4  ;;  %v48_v13 = vld [vmem:[%s997_s1 + $0xc8] sm:$0xff] }
   0x7   :  { %77 = vmatpush.msra.mxu1 %v52_v5 }
   0x8   :  { %58 = vmatpush.msra.mxu0 %v35_v6 }
   0x9   :  { %78 = vmatpush.msra.mxu1 %v51_v7 }
   0xa   :  { %59 = vmatpush.msra.mxu0 %v34_v8 }
   0xb   :  { %79 = vmatpush.msra.mxu1 %v50_v9 }
   0xc   :  { %60 = vmatpush.msra.mxu0 %v33_v10 }
   0xd   :  { %80 = vmatpush.msra.mxu1 %v49_v11 }
   0xe   :  { %10 = vsyncpa [#allocation3], 0  ;;  %v31_v14 = vld [vmem:[%s997_s1 + $0x40] sm:$0xff]  ;;  %61 = vmatpush.msra.mxu0 %v32_v12  ;;  %v30_v16 = vld [vmem:[%s997_s1 + $0x38] sm:$0xff]  ;;  %vm96_vm0 = vcmask 64512   ;;  %vm227_vm1 = vcmask 130048  }
   0xf   :  { %v47_v15 = vld [vmem:[%s997_s1 + $0xc0] sm:$0xff]  ;;  %81 = vmatpush.msra.mxu1 %v48_v13  ;;  %v46_v17 = vld [vmem:[%s997_s1 + $0xb8] sm:$0xff]  ;;  %v29_v18 = vld [vmem:[%s997_s1 + $0x30] sm:$0xff]  ;;  %s479_s15 = sshll.u32 %s1001_s5, 4  ;;  %s480_s15 = int_to_ptr.hbm [resolvable:$true] %s479_s15 }
  0x10   :  { %62 = vmatpush.msra.mxu0 %v31_v14  ;;  %v45_v19 = vld [vmem:[%s997_s1 + $0xb0] sm:$0xff]  ;;  %v28_v20 = vld [vmem:[%s997_s1 + $0x28] sm:$0xff]  ;;  %v27_v22 = vld [vmem:[%s997_s1 + $0x20] sm:$0xff] }
  0x11   :  { %82 = vmatpush.msra.mxu1 %v47_v15  ;;  %v44_v21 = vld [vmem:[%s997_s1 + $0xa8] sm:$0xff]  ;;  %v43_v23 = vld [vmem:[%s997_s1 + $0xa0] sm:$0xff]  ;;  %v26_v24 = vld [vmem:[%s997_s1 + $0x18] sm:$0xff] }
  0x12   :  { %63 = vmatpush.msra.mxu0 %v30_v16  ;;  %v42_v25 = vld [vmem:[%s997_s1 + $0x98] sm:$0xff]  ;;  %v25_v26 = vld [vmem:[%s997_s1 + $0x10] sm:$0xff]  ;;  %v24_v28 = vld [vmem:[%s997_s1 + $0x8] sm:$0xff] }
  0x13   :  { %83 = vmatpush.msra.mxu1 %v46_v17  ;;  %v41_v27 = vld [vmem:[%s997_s1 + $0x90] sm:$0xff]  ;;  %v40_v29 = vld [vmem:[%s997_s1 + $0x88] sm:$0xff]  ;;  %v23_v30 = vld [vmem:[%s997_s1] sm:$0xff] }
  0x14   :  { %64 = vmatpush.msra.mxu0 %v29_v18  ;;  %v39_v31 = vld [vmem:[%s997_s1 + $0x80] sm:$0xff]  ;;  %v736_v33 = vld [vmem:[%s996_s0 + $0x8] sm:$0xff]  ;;  %v504_v34 = vld [vmem:[%s997_s1 + $0x178] sm:$0xff] }
  0x15   :  { %84 = vmatpush.msra.mxu1 %v45_v19  ;;  %v731_v32 = vld [vmem:[%s996_s0] sm:$0xff]  ;;  %157 = vmatpush.msra.mxu3 %v504_v34  ;;  %v503_v35 = vld [vmem:[%s997_s1 + $0x170] sm:$0xff]  ;;  %v502_v36 = vld [vmem:[%s997_s1 + $0x168] sm:$0xff] }
  0x16   :  { %65 = vmatpush.msra.mxu0 %v28_v20  ;;  %v501_v37 = vld [vmem:[%s997_s1 + $0x160] sm:$0xff]  ;;  %v500_v38 = vld [vmem:[%s997_s1 + $0x158] sm:$0xff]  ;;  %v499_v39 = vld [vmem:[%s997_s1 + $0x150] sm:$0xff] }
  0x17   :  { %85 = vmatpush.msra.mxu1 %v44_v21  ;;  %158 = vmatpush.msra.mxu3 %v503_v35  ;;  %v498_v40 = vld [vmem:[%s997_s1 + $0x148] sm:$0xff]  ;;  %v497_v41 = vld [vmem:[%s997_s1 + $0x140] sm:$0xff]  ;;  %v496_v42 = vld [vmem:[%s997_s1 + $0x138] sm:$0xff] }
  0x18   :  { %66 = vmatpush.msra.mxu0 %v27_v22  ;;  %v495_v43 = vld [vmem:[%s997_s1 + $0x130] sm:$0xff]  ;;  %v494_v44 = vld [vmem:[%s997_s1 + $0x128] sm:$0xff]  ;;  %v493_v45 = vld [vmem:[%s997_s1 + $0x120] sm:$0xff] }
  0x19   :  { %86 = vmatpush.msra.mxu1 %v43_v23  ;;  %159 = vmatpush.msra.mxu3 %v502_v36  ;;  %v492_v46 = vld [vmem:[%s997_s1 + $0x118] sm:$0xff]  ;;  %v491_v47 = vld [vmem:[%s997_s1 + $0x110] sm:$0xff]  ;;  %v490_v48 = vld [vmem:[%s997_s1 + $0x108] sm:$0xff] }
  0x1a   :  { %67 = vmatpush.msra.mxu0 %v26_v24  ;;  %v489_v51 = vld [vmem:[%s997_s1 + $0x100] sm:$0xff]  ;;  %v520_v53 = vld [vmem:[%s997_s1 + $0x1f8] sm:$0xff]  ;;  %v519_v55 = vld [vmem:[%s997_s1 + $0x1f0] sm:$0xff] }
  0x1b   :  { %87 = vmatpush.msra.mxu1 %v42_v25  ;;  %160 = vmatpush.msra.mxu3 %v501_v37  ;;  %v95_v54 = vld [vmem:[%s998_s2] sm:$0xff]  ;;  %v562_v56 = vld [vmem:[%s997_s1 + $0x2f8] sm:$0xff]  ;;  %v561_v57 = vld [vmem:[%s997_s1 + $0x2f0] sm:$0xff] }
  0x1c   :  { %68 = vmatpush.msra.mxu0 %v25_v26  ;;  %v546_v58 = vld [vmem:[%s997_s1 + $0x278] sm:$0xff]  ;;  %v545_v59 = vld [vmem:[%s997_s1 + $0x270] sm:$0xff]  ;;  %v518_v60 = vld [vmem:[%s997_s1 + $0x1e8] sm:$0xff] }
  0x1d   :  { %88 = vmatpush.msra.mxu1 %v41_v27  ;;  %161 = vmatpush.msra.mxu3 %v500_v38  ;;  %v560_v61 = vld [vmem:[%s997_s1 + $0x2e8] sm:$0xff]  ;;  %v517_v63 = vld [vmem:[%s997_s1 + $0x1e0] sm:$0xff]  ;;  %v516_v1 = vld [vmem:[%s997_s1 + $0x1d8] sm:$0xff] }
  0x1e   :  { %69 = vmatpush.msra.mxu0 %v24_v28  ;;  %v544_v62 = vld [vmem:[%s997_s1 + $0x268] sm:$0xff]  ;;  %v559_v0 = vld [vmem:[%s997_s1 + $0x2e0] sm:$0xff]  ;;  %v558_v2 = vld [vmem:[%s997_s1 + $0x2d8] sm:$0xff] }
  0x1f   :  { %89 = vmatpush.msra.mxu1 %v40_v29  ;;  %162 = vmatpush.msra.mxu3 %v499_v39  ;;  %v515_v3 = vld [vmem:[%s997_s1 + $0x1d0] sm:$0xff]  ;;  %v514_v5 = vld [vmem:[%s997_s1 + $0x1c8] sm:$0xff]  ;;  %v513_v6 = vld [vmem:[%s997_s1 + $0x1c0] sm:$0xff] }
  0x20   :  { %70 = vmatpush.msra.mxu0 %v23_v30  ;;  %v557_v4 = vld [vmem:[%s997_s1 + $0x2d0] sm:$0xff]  ;;  %v512_v7 = vld [vmem:[%s997_s1 + $0x1b8] sm:$0xff]  ;;  %v510_v9 = vld [vmem:[%s997_s1 + $0x1a8] sm:$0xff] }
  0x21   :  { %90 = vmatpush.msra.mxu1 %v39_v31  ;;  %71 = vmatmul.f32.vlgmr.msra.gmra.mxu0 %v731_v32  ;;  %v511_v8 = vld [vmem:[%s997_s1 + $0x1b0] sm:$0xff]  ;;  %v509_v10 = vld [vmem:[%s997_s1 + $0x1a0] sm:$0xff]  ;;  %v508_v11 = vld [vmem:[%s997_s1 + $0x198] sm:$0xff] }
  0x22   :  { %91 = vmatmul.f32.vlgmr.msra.gmra.mxu1 %v736_v33  ;;  %163 = vmatpush.msra.mxu3 %v498_v40  ;;  %v507_v12 = vld [vmem:[%s997_s1 + $0x190] sm:$0xff]  ;;  %v506_v13 = vld [vmem:[%s997_s1 + $0x188] sm:$0xff]  ;;  %v505_v14 = vld [vmem:[%s997_s1 + $0x180] sm:$0xff] }
  0x23   :  { %347 = vmatpush.msrb.mxu1 %v546_v58  ;;  %v543_v15 = vld [vmem:[%s997_s1 + $0x260] sm:$0xff]  ;;  %v556_v16 = vld [vmem:[%s997_s1 + $0x2c8] sm:$0xff]  ;;  %v542_v17 = vld [vmem:[%s997_s1 + $0x258] sm:$0xff] }
  0x24   :  { %164 = vmatpush.msra.mxu3 %v497_v41  ;;  %v555_v18 = vld [vmem:[%s997_s1 + $0x2c0] sm:$0xff]  ;;  %v541_v19 = vld [vmem:[%s997_s1 + $0x250] sm:$0xff]  ;;  %v554_v20 = vld [vmem:[%s997_s1 + $0x2b8] sm:$0xff] }
  0x25   :  { %348 = vmatpush.msrb.mxu1 %v545_v59  ;;  %v540_v21 = vld [vmem:[%s997_s1 + $0x248] sm:$0xff]  ;;  %v553_v22 = vld [vmem:[%s997_s1 + $0x2b0] sm:$0xff]  ;;  %v539_v23 = vld [vmem:[%s997_s1 + $0x240] sm:$0xff] }
  0x26   :  { %165 = vmatpush.msra.mxu3 %v496_v42  ;;  %v552_v24 = vld [vmem:[%s997_s1 + $0x2a8] sm:$0xff]  ;;  %v538_v25 = vld [vmem:[%s997_s1 + $0x238] sm:$0xff]  ;;  %v551_v26 = vld [vmem:[%s997_s1 + $0x2a0] sm:$0xff] }
  0x27   :  { %349 = vmatpush.msrb.mxu1 %v544_v62  ;;  %v537_v27 = vld [vmem:[%s997_s1 + $0x230] sm:$0xff]  ;;  %v550_v28 = vld [vmem:[%s997_s1 + $0x298] sm:$0xff]  ;;  %v536_v29 = vld [vmem:[%s997_s1 + $0x228] sm:$0xff] }
  0x28   :  { %166 = vmatpush.msra.mxu3 %v495_v43  ;;  %v549_v30 = vld [vmem:[%s997_s1 + $0x290] sm:$0xff]  ;;  %v535_v31 = vld [vmem:[%s997_s1 + $0x220] sm:$0xff]  ;;  %v548_v34 = vld [vmem:[%s997_s1 + $0x288] sm:$0xff] }
  0x29   :  { %350 = vmatpush.msrb.mxu1 %v543_v15  ;;  %v534_v35 = vld [vmem:[%s997_s1 + $0x218] sm:$0xff]  ;;  %v547_v36 = vld [vmem:[%s997_s1 + $0x280] sm:$0xff]  ;;  %v533_v38 = vld [vmem:[%s997_s1 + $0x210] sm:$0xff] }
  0x2a   :  { %167 = vmatpush.msra.mxu3 %v494_v44  ;;  %v526_v37 = vld [vmem:[%s999_s3 + $0x38] sm:$0xff]  ;;  %v532_v39 = vld [vmem:[%s997_s1 + $0x208] sm:$0xff]  ;;  %v531_v40 = vld [vmem:[%s997_s1 + $0x200] sm:$0xff] }
  0x2b   :  { %351 = vmatpush.msrb.mxu1 %v542_v17  ;;  %v565_v58 = vld [vmem:[%s999_s3 + $0x40] sm:$0xff]  ;;  %v566_v59 = vld [vmem:[%s999_s3 + $0x48] sm:$0xff] }
  0x2c   :  { %168 = vmatpush.msra.mxu3 %v493_v45  ;;  %v525_v45 = vld [vmem:[%s999_s3 + $0x30] sm:$0xff] }
  0x2d   :  { %352 = vmatpush.msrb.mxu1 %v541_v19 }
  0x2e   :  { %169 = vmatpush.msra.mxu3 %v492_v46  ;;  %v524_v46 = vld [vmem:[%s999_s3 + $0x28] sm:$0xff] }
  0x2f   :  { %353 = vmatpush.msrb.mxu1 %v540_v21 }
  0x30   :  { %170 = vmatpush.msra.mxu3 %v491_v47  ;;  %v122_v47 = vld [vmem:[%s999_s3 + $0x10] sm:$0xff] }
  0x31   :  { %354 = vmatpush.msrb.mxu1 %v539_v23 }
  0x32   :  { %171 = vmatpush.msra.mxu3 %v490_v48  ;;  %v123_v48 = vld [vmem:[%s999_s3 + $0x18] sm:$0xff] }
  0x33   :  { %355 = vmatpush.msrb.mxu1 %v538_v25 }
  0x34   :  { %172 = vmatpush.msra.mxu3 %v489_v51 }
  0x35   :  { %173 = vmatmul.f32.vlgmr.msra.gmra.mxu3 %v731_v32  ;;  %356 = vmatpush.msrb.mxu1 %v537_v27 }
  0x36   :  { %367 = vmatpush.msrb.mxu3 %v562_v56  ;;  %v567_v56 = vld [vmem:[%s999_s3 + $0x50] sm:$0xff] }
  0x37   :  { %357 = vmatpush.msrb.mxu1 %v536_v29 }
  0x38   :  { %368 = vmatpush.msrb.mxu3 %v561_v57  ;;  %v568_v57 = vld [vmem:[%s999_s3 + $0x58] sm:$0xff] }
  0x39   :  { %358 = vmatpush.msrb.mxu1 %v535_v31 }
  0x3a   :  { %369 = vmatpush.msrb.mxu3 %v560_v61  ;;  %v600_v61 = vmov 0  }
  0x3b   :  { %359 = vmatpush.msrb.mxu1 %v534_v35  ;;  %573 = vset.pattern.permute.xlu0 %v600_v61 }
  0x3c   :  { %370 = vmatpush.msrb.mxu3 %v559_v0 }
  0x3d   :  { %360 = vmatpush.msrb.mxu1 %v533_v38 }
  0x3e   :  { %371 = vmatpush.msrb.mxu3 %v558_v2 }
  0x3f   :  { %361 = vmatpush.msrb.mxu1 %v532_v39 }
  0x40   :  { %372 = vmatpush.msrb.mxu3 %v557_v4 }
  0x41   :  { %362 = vmatpush.msrb.mxu1 %v531_v40 }
  0x42   :  { %373 = vmatpush.msrb.mxu3 %v556_v16  ;;  %363 = vmatmul.f32.vlgmr.msrb.gmra.mxu1 %v731_v32  ;;  %v523_v32 = vld [vmem:[%s999_s3 + $0x20] sm:$0xff] }
  0x44   :  { %374 = vmatpush.msrb.mxu3 %v555_v18 }
  0x46   :  { %375 = vmatpush.msrb.mxu3 %v554_v20 }
  0x48   :  { %376 = vmatpush.msrb.mxu3 %v553_v22 }
  0x4a   :  { %377 = vmatpush.msrb.mxu3 %v552_v24 }
  0x4c   :  { %378 = vmatpush.msrb.mxu3 %v551_v26 }
  0x4e   :  { %379 = vmatpush.msrb.mxu3 %v550_v28 }
  0x50   :  { %380 = vmatpush.msrb.mxu3 %v549_v30 }
  0x52   :  { %381 = vmatpush.msrb.mxu3 %v548_v34 }
  0x54   :  { %382 = vmatpush.msrb.mxu3 %v547_v36 }
  0x55   :  { %383 = vmatmul.f32.vlgmr.msrb.gmra.mxu3 %v736_v33 }
  0x9e   :  { %v72_v49 = vpop.f32.mrf.mxu0 }
  0x9f   :  { %v92_v50 = vpop.f32.mrf.mxu1 }
  0xa0   :  { %v93_v52 = vadd.f32 %v92_v50, %v72_v49  ;;  %v120_v49 = vld [vmem:[%s999_s3] sm:$0xff]  ;;  %v121_v50 = vld [vmem:[%s999_s3 + $0x8] sm:$0xff]  ;;  %s601_s3 = smov [#allocation2]  }
  0xa2   :  { %115 = vmatpush.msra.mxu2 %v93_v52 }
  0xa3   :  { %488 = vmatmul.msk.f32.vlgmr.msra.gmra.mxu2 %vm96_vm0, %v95_v54 }
  0xa4   :  { %177 = vmatpush.msrb.mxu2 %v520_v53 }
  0xa6   :  { %178 = vmatpush.msrb.mxu2 %v519_v55  ;;  %v563_v55 = vld [vmem:[%s998_s2 + $0x10] sm:$0xff] }
  0xa8   :  { %179 = vmatpush.msrb.mxu2 %v518_v60  ;;  %v462_v60 = vld [vmem:[%s1000_s4] sm:$0xff]  ;;  %s477_s4 = sshll.u32 %s601_s3, 4  ;;  %s478_s4 = int_to_ptr.vmem [resolvable:$true] %s477_s4 }
  0xa9   :  { %465 = vperm.xlu0 %573, %v462_v60  }
  0xaa   :  { %180 = vmatpush.msrb.mxu2 %v517_v63 }
  0xac   :  { %181 = vmatpush.msrb.mxu2 %v516_v1 }
  0xae   :  { %182 = vmatpush.msrb.mxu2 %v515_v3 }
  0xb0   :  { %183 = vmatpush.msrb.mxu2 %v514_v5 }
  0xb2   :  { %184 = vmatpush.msrb.mxu2 %v513_v6 }
  0xb4   :  { %185 = vmatpush.msrb.mxu2 %v512_v7 }
  0xb6   :  { %186 = vmatpush.msrb.mxu2 %v511_v8 }
  0xb8   :  { %187 = vmatpush.msrb.mxu2 %v510_v9  ;;  %v174_v42 = vpop.f32.mrf.mxu3 }
  0xba   :  { %188 = vmatpush.msrb.mxu2 %v509_v10 }
  0xbc   :  { %189 = vmatpush.msrb.mxu2 %v508_v11 }
  0xbe   :  { %190 = vmatpush.msrb.mxu2 %v507_v12 }
  0xbf   :  { %v364_v51 = vpop.f32.mrf.mxu1 }
  0xc0   :  { %191 = vmatpush.msrb.mxu2 %v506_v13 }
  0xc2   :  { %192 = vmatpush.msrb.mxu2 %v505_v14 }
  0xc3   :  { %193 = vmatmul.f32.vlgmr.msrb.gmra.mxu2 %v736_v33  ;;  %v521_v33 = vld [vmem:[%s998_s2 + $0x8] sm:$0xff] }
  0xc4   :  { %265 = vmatpush.msra.mxu2 %v526_v37 }
  0xc6   :  { %266 = vmatpush.msra.mxu2 %v524_v46 }
  0xc8   :  { %288 = vmatpush.msrb.mxu2 %v122_v47 }
  0xca   :  { %289 = vmatpush.msrb.mxu2 %v120_v49 }
  0xd8   :  { %v384_v52 = vpop.f32.mrf.mxu3 }
  0xd9   :  { %v385_v53 = vadd.f32 %v384_v52, %v364_v51 }
 0x11b   :  { %v466_v5 = vpop.permute.xlu0 %465 }
 0x126   :  { %v117_v41 = vpop.f32.mrf.mxu2 }
 0x146   :  { %v194_v43 = vpop.f32.mrf.mxu2 }
 0x147   :  { %v195_v44 = vadd.f32 %v194_v43, %v174_v42 }
 0x149   :  { %217 = vmatpush.msrb.mxu0 %v195_v44 }
 0x14a   :  { %522 = vmatmul.msk.f32.vlgmr.msrb.gmra.mxu0 %vm96_vm0, %v521_v33 }
 0x14b   :  { %245 = vmatpush.msra.mxu0 %v525_v45 }
 0x14d   :  { %246 = vmatpush.msra.mxu0 %v523_v32 }
 0x14f   :  { %308 = vmatpush.msrb.mxu0 %v123_v48 }
 0x151   :  { %309 = vmatpush.msrb.mxu0 %v121_v50 }
 0x1c7   :  { %v219_v54 = vpop.f32.mrf.mxu0 }
 0x1c8   :  { %527 = vmatmul.msk.f32.vlgmr.msra.gmra.mxu0 %vm227_vm1, %v219_v54  ;;  %528 = vmatmul.msk.f32.vlgmr.msra.gmra.mxu2 %vm227_vm1, %v219_v54 }
 0x1c9   :  { %407 = vmatpush.msra.mxu2 %v385_v53  ;;  %434 = vmatpush.msra.mxu0 %v567_v56 }
 0x1cb   :  { %435 = vmatpush.msra.mxu0 %v565_v58 }
 0x1d0   :  { %529 = vmatmul.msk.f32.vlgmr.msrb.gmra.mxu2 %vm227_vm1, %v117_v41  ;;  %530 = vmatmul.msk.f32.vlgmr.msrb.gmra.mxu0 %vm227_vm1, %v117_v41 }
 0x1d1   :  { %454 = vmatpush.msrb.mxu2 %v568_v57 }
 0x1d3   :  { %455 = vmatpush.msrb.mxu2 %v566_v59 }
 0x1d8   :  { %564 = vmatmul.msk.f32.vlgmr.msra.gmra.mxu2 %vm96_vm0, %v563_v55 }
 0x245   :  { %v248_v1 = vpop.f32.mrf.mxu0 }
 0x24b   :  { %v268_v62 = vpop.f32.mrf.mxu2 }
 0x24d   :  { %v311_v2 = vpop.f32.mrf.mxu0 }
 0x24e   :  { %v312_v8 = vadd.f32 %v311_v2, %v268_v62 }
 0x253   :  { %v291_v63 = vpop.f32.mrf.mxu2 }
 0x254   :  { %v292_v3 = vadd.f32 %v291_v63, %v248_v1 }
 0x25b   :  { %v409_v0 = vpop.f32.mrf.mxu2 }
 0x25c   :  { %569 = vmatmul.msk.f32.vlgmr.msra.gmra.mxu0 %vm227_vm1, %v409_v0  ;;  %570 = vmatmul.msk.f32.vlgmr.msrb.gmra.mxu2 %vm227_vm1, %v409_v0 }
 0x2d9   :  { %v437_v4 = vpop.f32.mrf.mxu0 }
 0x2da   :  { %v460_v6 = vadd.f32 %v437_v4, %v292_v3 }
 0x2dc   :  { %v468_v7 = vadd.f32 %v466_v5, %v460_v6 }
 0x2de   :  { %470 = vst [vmem:[#allocation2] sm:$0xff] %v468_v7 }
 0x2df   :  { %v457_v9 = vpop.f32.mrf.mxu2 }
 0x2e0   :  { %v461_v10 = vadd.f32 %v457_v9, %v312_v8 }
 0x2e2   :  { %v469_v11 = vadd.f32 %v466_v5, %v461_v10 }
 0x2e4   :  { %471 = vst [vmem:[#allocation2 + $0x8] sm:$0xff] %v469_v11 }
 0x2e5   :  { %482 = dma.vmem_to_hbm [thread:$0]  %s478_s4, 256, %s480_s15, [#allocation3]  }
 0x2e6   :  { %598 = dma.done.wait [#allocation3], 256  }
 0x2e7   :  { %599 = vsyncadd [#allocation3], 4294967040 }
 0x2e8   :  { %487 = vsyncpa [#allocation3], 1 }

</bundles_post_ra>
